<compile_context>
chip_gen: v5e
topology: v5e:2x2
jax: 0.10.0
libtpu: 0.0.40
codegen_flags: <defaults>
</compile_context>

<pallas_src>
import functools

import jax
import jax.numpy as jnp
from jax import lax
from jax.experimental import pallas as pl
from jax.experimental.pallas import tpu as pltpu


def _ce_kernel(x_ref, t_ref, out_ref, acc,
               *, padding_idx, n_rows, row_tile, blocks_per_split,
               cast_to_f32, exact_argmax):
    c = pl.program_id(0)            # core-split index
    i = pl.program_id(1)            # row-block index within split (arbitrary)
    n_i = pl.num_programs(1)

    @pl.when(i == 0)
    def _():
        acc[...] = jnp.zeros_like(acc)

    x = x_ref[...]                  # (tm, V) native dtype
    if cast_to_f32:
        x = x.astype(jnp.float32)
    tgt = t_ref[...]                # (tm, 1) int32
    tm, v = x.shape

    # Row-validity mask for the (possibly clamped / partial) last block.
    blk = c * blocks_per_split + i              # intended (unclamped) block index
    row0 = blk * row_tile
    local = lax.broadcasted_iota(jnp.int32, (tm, 1), 0)
    valid = jnp.logical_and((row0 + local) < n_rows, tgt != padding_idx)

    # One-hot pick of the target column.
    # TODO(synk): targets outside [0, V) that are not padding_idx contribute
    # -log_z (no bounds check), matching the reference's undefined behaviour.
    col = lax.broadcasted_iota(jnp.int32, (tm, v), 1)
    onehot = col == tgt

    # Numerically stable log-softmax; max/shift stay in the native dtype, only the
    # exp / sum / log path runs in f32.
    row_max = jnp.max(x, axis=-1, keepdims=True)
    shifted = x - row_max
    sumexp = jnp.sum(jnp.exp(shifted.astype(jnp.float32)), axis=-1, keepdims=True)
    log_z = jnp.log(sumexp)                                   # (tm, 1) f32

    # Single-element select+sum is exact in any dtype; cast the (tm,1) result only.
    picked_shifted = jnp.sum(jnp.where(onehot, shifted, jnp.zeros_like(shifted)),
                             axis=-1, keepdims=True).astype(jnp.float32)
    picked_logprob = picked_shifted - log_z                   # (tm, 1)
    picked_prob = jnp.exp(picked_logprob)                     # (tm, 1)

    if exact_argmax:
        # torch.argmax first-maximal-index tie-break (costs ~3 extra VALU ops/elem).
        amax = jnp.min(jnp.where(x == row_max, col, v), axis=-1, keepdims=True)
        hit_cond = jnp.logical_and(valid, amax == tgt)
    else:
        # Relaxed tie-break: hit whenever the target attains the row max.
        hit_cond = jnp.logical_and(valid, picked_shifted == 0.0)

    ones = jnp.ones_like(picked_shifted)
    zeros = jnp.zeros_like(picked_shifted)
    ce_blk = jnp.sum(jnp.where(valid, -picked_logprob, zeros))
    lk_blk = jnp.sum(jnp.where(valid, picked_prob, zeros))
    hit_blk = jnp.sum(jnp.where(hit_cond, ones, zeros))
    frm_blk = jnp.sum(jnp.where(valid, ones, zeros))

    # Accumulate the 4 block scalars into sublanes 0..3 of one resident vreg.
    sub = lax.broadcasted_iota(jnp.int32, acc.shape, 1)
    step = jnp.where(sub == 0, ce_blk,
           jnp.where(sub == 1, lk_blk,
           jnp.where(sub == 2, hit_blk,
           jnp.where(sub == 3, frm_blk, 0.0))))
    acc[...] += step

    @pl.when(i == n_i - 1)
    def _():
        out_ref[...] = acc[...].astype(out_ref.dtype)


def _device_kind():
    try:
        return jax.devices()[0].device_kind.lower()
    except Exception:
        return ""


def _vmem_capacity_bytes():
    try:
        cap = int(pltpu.get_tpu_info().vmem_capacity_bytes)
        if cap > 0:
            return cap
    except Exception:
        pass
    return 128 << 20


def _num_tensorcores(kind):
    """Best-effort TensorCores-per-device (megacore / dual-TC detection)."""
    if not kind or "lite" in kind:                 # v5e / v6e report "... lite"
        return 1
    for tag in ("v4", "v5p", "v5 p", "v7"):
        if tag in kind:
            return 2
    return 1


def _sublane_multiple(dtype):
    # Native sublane packing tile: f32 -> 8, bf16/f16 -> 16, int8/fp8 -> 32.
    return {4: 8, 2: 16, 1: 32}.get(jnp.dtype(dtype).itemsize, 8)


def _pick_row_tile(n_rows, per_row_bytes, requested, budget_bytes, sublane):
    """Largest sublane-aligned row tile whose working set fits the budget."""
    rt = max(sublane, (requested // sublane) * sublane)
    while rt > sublane and rt * per_row_bytes > budget_bytes:
        rt //= 2
    rt = max(sublane, (rt // sublane) * sublane)
    rows_rounded = -(-n_rows // sublane) * sublane
    return max(sublane, min(rt, rows_rounded))


def ce_loss(output, target, *, padding_idx, blank_idx=None,
            mean_in_frames=False, row_tile=None, exact_argmax=False):
    """Pallas implementation of CELoss.forward.

    output: (B, T, V) float logits (any float dtype).  target: (B, T) int ids.
    Returns (ce_loss, (ce_sum, likely, hit), (frames, frames, frames)).
    """
    del blank_idx  # unused in the reference forward pass
    B, T, V = output.shape
    N = B * T
    x = output.reshape(N, V)                 # native dtype; no pads, no casts
    t = target.reshape(N, 1).astype(jnp.int32)

    kind = _device_kind()
    vmem_cap = _vmem_capacity_bytes()
    itemsize = jnp.dtype(x.dtype).itemsize
    sublane = _sublane_multiple(x.dtype)

    # Keep bf16 math native only where the VPU has bf16 lanes (v6e/v7x), not v5e.
    is_v5e = ("v5 lite" in kind) or ("v5e" in kind) or ("v5lite" in kind)
    cast_to_f32 = (jnp.dtype(x.dtype) != jnp.dtype(jnp.bfloat16)) or is_v5e

    if row_tile is None:
        row_tile = 2048 if vmem_cap >= (96 << 20) else 1024

    # Working set per block row: double-buffered native logits + ~3x f32
    # intermediates (shifted / exp / iota / masks) + the int32 target column.
    per_row_bytes = 2 * V * itemsize + 3 * V * 4 + 2 * 4
    tile_budget = min(int(vmem_cap * 0.45), 72 << 20)
    rt = _pick_row_tile(N, per_row_bytes, row_tile, tile_budget, sublane)
    # TODO(synk): for very large vocab (V >~ 64k) add an inner V-tile reduction
    # axis with an online running max/sum-exp instead of full-V blocks.

    nblk = -(-N // rt)                       # total row blocks
    num_tc = _num_tensorcores(kind)
    num_splits = 2 if (num_tc >= 2 and nblk >= 2) else 1
    bpc = -(-nblk // num_splits)             # row blocks per split

    if num_splits > 1:
        core_par = getattr(pltpu, "CORE_PARALLEL", None)
        split_sem = core_par if (core_par is not None and "v7" in kind) else "parallel"
    else:
        split_sem = "arbitrary"

    def row_map(c, i):
        # clamp so the DMA stays in-bounds; the kernel masks duplicated rows.
        return (jnp.minimum(c * bpc + i, nblk - 1), 0)

    kern = functools.partial(
        _ce_kernel, padding_idx=padding_idx, n_rows=N, row_tile=rt,
        blocks_per_split=bpc, cast_to_f32=cast_to_f32, exact_argmax=exact_argmax)

    work_bytes = rt * per_row_bytes
    vmem_limit = int(max(min(work_bytes + (8 << 20), int(vmem_cap * 0.75)), 32 << 20))

    partials = pl.pallas_call(
        kern,
        out_shape=jax.ShapeDtypeStruct((num_splits, 8, 128), jnp.float32),
        grid_spec=pltpu.PrefetchScalarGridSpec(
            num_scalar_prefetch=0,
            grid=(num_splits, bpc),
            in_specs=[
                pl.BlockSpec((rt, V), row_map),
                pl.BlockSpec((rt, 1), row_map),
            ],
            out_specs=pl.BlockSpec((1, 8, 128), lambda c, i: (c, 0, 0)),
            scratch_shapes=[pltpu.VMEM((1, 8, 128), jnp.float32)],
        ),
        compiler_params=pltpu.CompilerParams(
            dimension_semantics=(split_sem, "arbitrary"),
            vmem_limit_bytes=vmem_limit),
    )(x, t)

    sums = jnp.sum(partials[:, :4, 0], axis=0)   # (4,) across core splits
    ce_sum = sums[0]
    likely = sums[1]
    hit = sums[2].astype(jnp.int32)      # TODO(synk): f32 counts are exact to 2^24 frames
    frames = sums[3].astype(jnp.int32)

    # TODO(synk): mean_in_frames divides by frames and NaNs if every row is padding
    # (matches the reference, which would divide by zero).
    ce_out = ce_sum / sums[3] if mean_in_frames else ce_sum
    metric = (ce_sum, likely, hit)
    count = (frames, frames, frames)
    return ce_out, metric, count


def _reference(output, target, padding_idx):
    """Plain-JAX reference of the PyTorch forward for verification."""
    B, T, V = output.shape
    x = output.reshape(-1, V).astype(jnp.float32)
    t = target.reshape(-1).astype(jnp.int32)
    logp = jax.nn.log_softmax(x, axis=-1)
    p = jax.nn.softmax(x, axis=-1)
    mask = (t != padding_idx).astype(jnp.float32)
    picked_logp = jnp.take_along_axis(logp, t[:, None], axis=-1)[:, 0]
    picked_p = jnp.take_along_axis(p, t[:, None], axis=-1)[:, 0]
    ce = jnp.sum(-picked_logp * mask)
    likely = jnp.sum(picked_p * mask)
    hit = jnp.sum((jnp.argmax(x, axis=-1) == t).astype(jnp.float32) * mask)
    frames = jnp.sum(mask)
    return ce, likely, hit, frames


if __name__ == "__main__":
    padding_idx = 0
    blank_idx = 1
    B, T, V = 2, 8, 32

    key = jax.random.PRNGKey(0)
    k1, k2 = jax.random.split(key)
    output = jax.random.normal(k1, (B, T, V), dtype=jnp.float32)
    target = jax.random.randint(k2, (B, T), 0, V, dtype=jnp.int32)  # 0 == padding sometimes

    ce, metric, count = ce_loss(output, target, padding_idx=padding_idx,
                                blank_idx=blank_idx, mean_in_frames=False)
    ce = jax.block_until_ready(ce)

    # silent correctness check against a plain-JAX reference
    ref_ce, ref_likely, ref_hit, ref_frames = _reference(output, target, padding_idx)
    assert jnp.allclose(ce, ref_ce, rtol=1e-5, atol=1e-5)
    assert jnp.allclose(metric[1], ref_likely, rtol=1e-5, atol=1e-5)
    assert int(metric[2]) == int(ref_hit)
    assert int(count[0]) == int(ref_frames)

    # also exercise the exact (torch.argmax tie-break) hit path
    ce2, metric2, _ = ce_loss(output, target, padding_idx=padding_idx,
                              blank_idx=blank_idx, exact_argmax=True)
    jax.block_until_ready(ce2)
    assert jnp.allclose(ce2, ref_ce, rtol=1e-5, atol=1e-5)
    assert int(metric2[2]) == int(ref_hit)

    print("KERNEL_OK")
</pallas_src>

<mosaic_0001>
module attributes {stable_mosaic.version = 11 : i64} {
  func.func @_ce_kernel(%arg0: i32, %arg1: i32, %arg2: memref<16x32xf32, #tpu.memory_space<vmem>>, %arg3: memref<16x1xi32, #tpu.memory_space<vmem>>, %arg4: memref<1x8x128xf32, #tpu.memory_space<vmem>>, %arg5: memref<1x8x128xf32, #tpu.memory_space<vmem>>) attributes {dimension_semantics = [#tpu.dimension_semantics<arbitrary>, #tpu.dimension_semantics<arbitrary>], iteration_bounds = array<i64: 1, 1>, scalar_prefetch = 0 : i64, scratch_operands = 1 : i64, tpu.core_type = #tpu.core_type<tc>, window_params = [{transform_indices = @transform_0, window_bounds = array<i64: 16, 32>}, {transform_indices = @transform_1, window_bounds = array<i64: 16, 1>}, {transform_indices = @transform_2, window_bounds = array<i64: 1, 8, 128>}]} {
    %c0_i32 = arith.constant 0 : i32
    %0 = arith.cmpi eq, %arg1, %c0_i32 : i32
    %1 = arith.extui %0 : i1 to i32
    %c0_i32_0 = arith.constant 0 : i32
    %2 = arith.cmpi ne, %1, %c0_i32_0 : i32
    scf.if %2 {
      %cst_28 = arith.constant 0.000000e+00 : f32
      %84 = vector.broadcast %cst_28 : f32 to vector<1x8x128xf32>
      %c0_29 = arith.constant 0 : index
      %c0_30 = arith.constant 0 : index
      %c0_31 = arith.constant 0 : index
      %85 = vector.load %arg5[%c0_29, %c0_30, %c0_31] : memref<1x8x128xf32, #tpu.memory_space<vmem>>, vector<1x8x128xf32>
      tpu.vector_store %arg5[%c0_29, %c0_30, %c0_31], %84 {strides = array<i32>} : memref<1x8x128xf32, #tpu.memory_space<vmem>>, vector<1x8x128xf32>,
    } else {
    }
    %c0 = arith.constant 0 : index
    %c0_1 = arith.constant 0 : index
    %3 = vector.load %arg2[%c0, %c0_1] : memref<16x32xf32, #tpu.memory_space<vmem>>, vector<16x32xf32>
    %c0_2 = arith.constant 0 : index
    %c0_3 = arith.constant 0 : index
    %4 = vector.load %arg3[%c0_2, %c0_3] : memref<16x1xi32, #tpu.memory_space<vmem>>, vector<16x1xi32>
    %c1_i32 = arith.constant 1 : i32
    %5 = arith.muli %arg0, %c1_i32 : i32
    %6 = arith.addi %5, %arg1 : i32
    %c16_i32 = arith.constant 16 : i32
    %7 = arith.muli %6, %c16_i32 : i32
    %8 = tpu.iota {dimensions = array<i32: 0>} : vector<16x1xi32>
    %9 = vector.broadcast %7 : i32 to vector<16x1xi32>
    %10 = arith.addi %9, %8 : vector<16x1xi32>
    %c16_i32_4 = arith.constant 16 : i32
    %11 = vector.broadcast %c16_i32_4 : i32 to vector<16x1xi32>
    %12 = arith.cmpi slt, %10, %11 : vector<16x1xi32>
    %c0_i32_5 = arith.constant 0 : i32
    %13 = vector.broadcast %c0_i32_5 : i32 to vector<16x1xi32>
    %14 = arith.cmpi ne, %4, %13 : vector<16x1xi32>
    %15 = arith.andi %12, %14 : vector<16x1xi1>
    %16 = tpu.iota {dimensions = array<i32: 1>} : vector<16x32xi32>
    %17 = vector.broadcast %4 : vector<16x1xi32> to vector<16x32xi32>
    %18 = arith.cmpi eq, %16, %17 : vector<16x32xi32>
    %cst = arith.constant dense<0xFF800000> : vector<16xf32>
    %19 = vector.multi_reduction <maximumf>, %3, %cst [1] : vector<16x32xf32> to vector<16xf32>
    %20 = vector.shape_cast %19 : vector<16xf32> to vector<16x1xf32>
    %21 = vector.broadcast %20 : vector<16x1xf32> to vector<16x32xf32>
    %22 = arith.subf %3, %21 : vector<16x32xf32>
    %23 = math.exp %22 : vector<16x32xf32>
    %cst_6 = arith.constant dense<0.000000e+00> : vector<16xf32>
    %24 = vector.multi_reduction <add>, %23, %cst_6 [1] : vector<16x32xf32> to vector<16xf32>
    %25 = vector.shape_cast %24 : vector<16xf32> to vector<16x1xf32>
    %26 = math.log %25 : vector<16x1xf32>
    %cst_7 = arith.constant 0.000000e+00 : f32
    %27 = vector.broadcast %cst_7 : f32 to vector<16x32xf32>
    %28 = arith.select %18, %22, %27 : vector<16x32xi1>, vector<16x32xf32>
    %cst_8 = arith.constant dense<0.000000e+00> : vector<16xf32>
    %29 = vector.multi_reduction <add>, %28, %cst_8 [1] : vector<16x32xf32> to vector<16xf32>
    %30 = vector.shape_cast %29 : vector<16xf32> to vector<16x1xf32>
    %31 = arith.subf %30, %26 : vector<16x1xf32>
    %32 = math.exp %31 : vector<16x1xf32>
    %cst_9 = arith.constant 0.000000e+00 : f32
    %33 = vector.broadcast %cst_9 : f32 to vector<16x1xf32>
    %34 = arith.cmpf oeq, %30, %33 : vector<16x1xf32>
    %35 = arith.andi %15, %34 : vector<16x1xi1>
    %cst_10 = arith.constant 1.000000e+00 : f32
    %36 = vector.broadcast %cst_10 : f32 to vector<16x1xf32>
    %cst_11 = arith.constant 0.000000e+00 : f32
    %37 = vector.broadcast %cst_11 : f32 to vector<16x1xf32>
    %cst_12 = arith.constant 0.000000e+00 : f32
    %38 = vector.broadcast %cst_12 : f32 to vector<16x1xf32>
    %39 = arith.subf %38, %31 : vector<16x1xf32>
    %40 = arith.select %15, %39, %37 : vector<16x1xi1>, vector<16x1xf32>
    %41 = vector.shape_cast %40 : vector<16x1xf32> to vector<1x16x1xf32>
    %cst_13 = arith.constant dense<0.000000e+00> : vector<1xf32>
    %42 = vector.multi_reduction <add>, %41, %cst_13 [1, 2] : vector<1x16x1xf32> to vector<1xf32>
    %43 = vector.shape_cast %42 : vector<1xf32> to vector<1x1x1xf32>
    %44 = vector.extract %43[0, 0, 0] : f32 from vector<1x1x1xf32>
    %45 = arith.select %15, %32, %37 : vector<16x1xi1>, vector<16x1xf32>
    %46 = vector.shape_cast %45 : vector<16x1xf32> to vector<1x16x1xf32>
    %cst_14 = arith.constant dense<0.000000e+00> : vector<1xf32>
    %47 = vector.multi_reduction <add>, %46, %cst_14 [1, 2] : vector<1x16x1xf32> to vector<1xf32>
    %48 = vector.shape_cast %47 : vector<1xf32> to vector<1x1x1xf32>
    %49 = vector.extract %48[0, 0, 0] : f32 from vector<1x1x1xf32>
    %50 = arith.select %35, %36, %37 : vector<16x1xi1>, vector<16x1xf32>
    %51 = vector.shape_cast %50 : vector<16x1xf32> to vector<1x16x1xf32>
    %cst_15 = arith.constant dense<0.000000e+00> : vector<1xf32>
    %52 = vector.multi_reduction <add>, %51, %cst_15 [1, 2] : vector<1x16x1xf32> to vector<1xf32>
    %53 = vector.shape_cast %52 : vector<1xf32> to vector<1x1x1xf32>
    %54 = vector.extract %53[0, 0, 0] : f32 from vector<1x1x1xf32>
    %55 = arith.select %15, %36, %37 : vector<16x1xi1>, vector<16x1xf32>
    %56 = vector.shape_cast %55 : vector<16x1xf32> to vector<1x16x1xf32>
    %cst_16 = arith.constant dense<0.000000e+00> : vector<1xf32>
    %57 = vector.multi_reduction <add>, %56, %cst_16 [1, 2] : vector<1x16x1xf32> to vector<1xf32>
    %58 = vector.shape_cast %57 : vector<1xf32> to vector<1x1x1xf32>
    %59 = vector.extract %58[0, 0, 0] : f32 from vector<1x1x1xf32>
    %60 = tpu.iota {dimensions = array<i32: 1>} : vector<1x8x128xi32>
    %c0_i32_17 = arith.constant 0 : i32
    %61 = vector.broadcast %c0_i32_17 : i32 to vector<1x8x128xi32>
    %62 = arith.cmpi eq, %60, %61 : vector<1x8x128xi32>
    %c1_i32_18 = arith.constant 1 : i32
    %63 = vector.broadcast %c1_i32_18 : i32 to vector<1x8x128xi32>
    %64 = arith.cmpi eq, %60, %63 : vector<1x8x128xi32>
    %c2_i32 = arith.constant 2 : i32
    %65 = vector.broadcast %c2_i32 : i32 to vector<1x8x128xi32>
    %66 = arith.cmpi eq, %60, %65 : vector<1x8x128xi32>
    %c3_i32 = arith.constant 3 : i32
    %67 = vector.broadcast %c3_i32 : i32 to vector<1x8x128xi32>
    %68 = arith.cmpi eq, %60, %67 : vector<1x8x128xi32>
    %cst_19 = arith.constant 0.000000e+00 : f32
    %69 = vector.broadcast %59 : f32 to vector<1x8x128xf32>
    %70 = vector.broadcast %cst_19 : f32 to vector<1x8x128xf32>
    %71 = arith.select %68, %69, %70 : vector<1x8x128xi1>, vector<1x8x128xf32>
    %72 = vector.broadcast %54 : f32 to vector<1x8x128xf32>
    %73 = arith.select %66, %72, %71 : vector<1x8x128xi1>, vector<1x8x128xf32>
    %74 = vector.broadcast %49 : f32 to vector<1x8x128xf32>
    %75 = arith.select %64, %74, %73 : vector<1x8x128xi1>, vector<1x8x128xf32>
    %76 = vector.broadcast %44 : f32 to vector<1x8x128xf32>
    %77 = arith.select %62, %76, %75 : vector<1x8x128xi1>, vector<1x8x128xf32>
    %c0_20 = arith.constant 0 : index
    %c0_21 = arith.constant 0 : index
    %c0_22 = arith.constant 0 : index
    %78 = vector.load %arg5[%c0_20, %c0_21, %c0_22] : memref<1x8x128xf32, #tpu.memory_space<vmem>>, vector<1x8x128xf32>
    %79 = arith.addf %78, %77 : vector<1x8x128xf32>
    %c0_23 = arith.constant 0 : index
    %c0_24 = arith.constant 0 : index
    %c0_25 = arith.constant 0 : index
    %80 = vector.load %arg5[%c0_23, %c0_24, %c0_25] : memref<1x8x128xf32, #tpu.memory_space<vmem>>, vector<1x8x128xf32>
    tpu.vector_store %arg5[%c0_23, %c0_24, %c0_25], %79 {strides = array<i32>} : memref<1x8x128xf32, #tpu.memory_space<vmem>>, vector<1x8x128xf32>,
    %c0_i32_26 = arith.constant 0 : i32
    %81 = arith.cmpi eq, %arg1, %c0_i32_26 : i32
    %82 = arith.extui %81 : i1 to i32
    %c0_i32_27 = arith.constant 0 : i32
    %83 = arith.cmpi ne, %82, %c0_i32_27 : i32
    scf.if %83 {
      %c0_28 = arith.constant 0 : index
      %c0_29 = arith.constant 0 : index
      %c0_30 = arith.constant 0 : index
      %84 = vector.load %arg5[%c0_28, %c0_29, %c0_30] : memref<1x8x128xf32, #tpu.memory_space<vmem>>, vector<1x8x128xf32>
      %c0_31 = arith.constant 0 : index
      %c0_32 = arith.constant 0 : index
      %c0_33 = arith.constant 0 : index
      %85 = vector.load %arg4[%c0_31, %c0_32, %c0_33] : memref<1x8x128xf32, #tpu.memory_space<vmem>>, vector<1x8x128xf32>
      tpu.vector_store %arg4[%c0_31, %c0_32, %c0_33], %84 {strides = array<i32>} : memref<1x8x128xf32, #tpu.memory_space<vmem>>, vector<1x8x128xf32>,
    } else {
    }
    return
  }
  func.func @transform_0(%arg0: i32, %arg1: i32) -> (i32, i32) {
    %c1_i32 = arith.constant 1 : i32
    %0 = arith.muli %arg0, %c1_i32 : i32
    %1 = arith.addi %0, %arg1 : i32
    %c0_i32 = arith.constant 0 : i32
    %2 = arith.minsi %1, %c0_i32 : i32
    %c0_i32_0 = arith.constant 0 : i32
    %c0_i32_1 = arith.constant 0 : i32
    return %2, %c0_i32_0 : i32, i32
  }
  func.func @transform_1(%arg0: i32, %arg1: i32) -> (i32, i32) {
    %c1_i32 = arith.constant 1 : i32
    %0 = arith.muli %arg0, %c1_i32 : i32
    %1 = arith.addi %0, %arg1 : i32
    %c0_i32 = arith.constant 0 : i32
    %2 = arith.minsi %1, %c0_i32 : i32
    %c0_i32_0 = arith.constant 0 : i32
    %c0_i32_1 = arith.constant 0 : i32
    return %2, %c0_i32_0 : i32, i32
  }
  func.func @transform_2(%arg0: i32, %arg1: i32) -> (i32, i32, i32) {
    %c0_i32 = arith.constant 0 : i32
    %c0_i32_0 = arith.constant 0 : i32
    %c0_i32_1 = arith.constant 0 : i32
    return %arg0, %c0_i32, %c0_i32_0 : i32, i32, i32
  }
}

</mosaic_0001>

<bundles_post_ra>
// kernel: tpu_custom_call.1
= control target key start
LH: loop header
LB: loop body
LE: loop exit
PB: predicated region body
PF: predicated region fallthrough
CT: control target
= control target key end

     0   :  { %vm109_vm0 = vcmask 261120   ;;  %v308_v3 = vmov 0   ;;  %s381_s0 = inlined_call_operand.vmem [shape: f32[16,32], index: 0, kind: input, shape index: {}]   ;;  %s382_s1 = inlined_call_operand.vmem [shape: s32[16,1], index: 1, kind: input, shape index: {}]   ;;  %s383_s2 = inlined_call_operand.hbm [shape: f32[1,8,128], index: 2, kind: output, shape index: {}]  }
   0x1   :  { %v81_v0 = vld [vmem:[%s381_s0] sm:$0xff]  ;;  %268 = vset.pattern.permute.xlu1 %v308_v3  ;;  %269 = vset.pattern.permute.xlu0 %v308_v3 }
   0x2   :  { %v332_v1 = vld [vmem:[%s382_s1] sm:$0xff]  ;;  %v110_v2 = vsel %vm109_vm0, %v81_v0, -inf }
   0x3   :  { %7 = vsyncpa [#allocation4], 0  ;;  %111 = vmax.xlane.f32.xlu0 %v110_v2  ;;  %102 = vperm.xlu1 %268, %v332_v1   ;;  %v82_v4 = vld [vmem:[%s381_s0 + $0x8] sm:$0xff]  ;;  %v87_v7 = vlaneseq  ;;  %vm95_vm3 = vcmp.ne.s32.totalorder %v332_v1, 0  ;;  %vm154_vm8 = vcmask 7168   ;;  %v309_v28 = vmov 0.0  }
   0x4   :  { %v113_v5 = vsel %vm109_vm0, %v82_v4, -inf  ;;  %v343_v6 = vld [vmem:[%s382_s1 + $0x8] sm:$0xff]  ;;  %v195_v30 = vsel %vm95_vm3, 1.0, %v309_v28  ;;  %s310_s19 = smov [#allocation3]   ;;  %s236_s23 = sshll.u32 %s383_s2, 4  ;;  %s237_s23 = int_to_ptr.hbm [resolvable:$true] %s236_s23 }
   0x5   :  { %v100_v8 = vand.u32 127, %v87_v7  ;;  %vm96_vm6 = vcmp.ne.s32.totalorder %v343_v6, 0  ;;  %v197_v33 = vsel %vm154_vm8, %v195_v30, 0.0  ;;  %s234_s20 = sshll.u32 %s310_s19, 4  ;;  %s235_s20 = int_to_ptr.vmem [resolvable:$true] %s234_s20 }
   0x6   :  { %v196_v31 = vsel %vm96_vm6, 1.0, %v309_v28 }
   0x7   :  { %v198_v34 = vsel %vm154_vm8, %v196_v31, 0.0 }
   0x8   :  { %v199_v37 = vadd.f32 %v198_v34, %v197_v33 }
   0xb   :  { %114 = vmax.xlane.f32.xlu0 %v113_v5  ;;  %105 = vperm.xlu1 %268, %v343_v6  }
  0x75   :  { %v103_v9 = vpop.permute.xlu1 %102 }
  0x76   :  { %v112_v10 = vpop.xlane.xlu0 %111  ;;  %vm107_vm1 = vcmp.eq.s32.totalorder %v100_v8, %v103_v9 }
  0x77   :  { %v116_v11 = vsub.f32 %v81_v0, %v112_v10 }
  0x79   :  { %v118_v12 = vmul.f32 1.442695, %v116_v11  ;;  %v132_v13 = vsel %vm107_vm1, %v116_v11, 0.0 }
  0x7a   :  { %v134_v14 = vsel %vm109_vm0, %v132_v13, 0.0 }
  0x7b   :  { %270 = vpow2.f32 %v118_v12  ;;  %135 = vadd.xlane.f32.xlu0 %v134_v14 }
  0x7d   :  { %v106_v15 = vpop.permute.xlu1 %105 }
  0x7e   :  { %v115_v16 = vpop.xlane.xlu0 %114  ;;  %vm108_vm2 = vcmp.eq.s32.totalorder %v100_v8, %v106_v15 }
  0x7f   :  { %v117_v17 = vsub.f32 %v82_v4, %v115_v16 }
  0x81   :  { %v271_v18 = vpop.eup %270  ;;  %v120_v19 = vmul.f32 1.442695, %v117_v17  ;;  %v133_v20 = vsel %vm108_vm2, %v117_v17, 0.0 }
  0x82   :  { %v122_v21 = vsel %vm109_vm0, %v271_v18, 0.0  ;;  %v137_v22 = vsel %vm109_vm0, %v133_v20, 0.0 }
  0x83   :  { %272 = vpow2.f32 %v120_v19  ;;  %123 = vadd.xlane.f32.xlu2 %v122_v21  ;;  %138 = vadd.xlane.f32.xlu1 %v137_v22 }
  0x89   :  { %v273_v23 = vpop.eup %272 }
  0x8a   :  { %v125_v24 = vsel %vm109_vm0, %v273_v23, 0.0 }
  0x8b   :  { %126 = vadd.xlane.f32.xlu2 %v125_v24 }
  0xee   :  { %v136_v25 = vpop.xlane.xlu0 %135 }
  0xef   :  { %vm146_vm4 = vcmp.eq.f32.partialorder %v136_v25, 0.0 }
  0xf0   :  { %vm148_vm5 = vmand %vm95_vm3, %vm146_vm4 }
  0xf1   :  { %v181_v29 = vsel %vm148_vm5, 1.0, %v309_v28 }
  0xf2   :  { %v183_v35 = vsel %vm154_vm8, %v181_v29, 0.0 }
  0xf6   :  { %v124_v26 = vpop.xlane.xlu2 %123  ;;  %v139_v27 = vpop.xlane.xlu1 %138 }
  0xf7   :  { %274 = vlog2.f32 %v124_v26  ;;  %vm147_vm7 = vcmp.eq.f32.partialorder %v139_v27, 0.0 }
  0xf8   :  { %vm149_vm9 = vmand %vm96_vm6, %vm147_vm7 }
  0xf9   :  { %v182_v32 = vsel %vm149_vm9, 1.0, %v309_v28 }
  0xfa   :  { %v184_v36 = vsel %vm154_vm8, %v182_v32, 0.0 }
  0xfb   :  { %v185_v38 = vadd.f32 %v184_v36, %v183_v35 }
  0xfd   :  { %v275_v39 = vpop.eup %274 }
  0xfe   :  { %v129_v40 = vmul.f32 0.6931472, %v275_v39  ;;  %v127_v41 = vpop.xlane.xlu2 %126 }
  0xff   :  { %276 = vlog2.f32 %v127_v41 }
 0x100   :  { %v140_v42 = vsub.f32 %v136_v25, %v129_v40 }
 0x102   :  { %v142_v43 = vmul.f32 1.442695, %v140_v42  ;;  %v150_v46 = vsub.f32 0.0, %v140_v42 }
 0x104   :  { %278 = vpow2.f32 %v142_v43  ;;  %v152_v50 = vsel %vm95_vm3, %v150_v46, 0.0 }
 0x105   :  { %v277_v44 = vpop.eup %276  ;;  %v155_v52 = vsel %vm154_vm8, %v152_v50, 0.0 }
 0x106   :  { %v131_v45 = vmul.f32 0.6931472, %v277_v44 }
 0x108   :  { %v141_v47 = vsub.f32 %v139_v27, %v131_v45  ;;  %v88_v27 = vshrl.u32 %v87_v7, 7 }
 0x10a   :  { %v144_v48 = vmul.f32 1.442695, %v141_v47  ;;  %v151_v49 = vsub.f32 0.0, %v141_v47  ;;  %v279_v54 = vpop.eup %278  ;;  %vm212_vm10 = vcmp.eq.s32.totalorder %v88_v27, 3  ;;  %vm211_vm11 = vcmp.eq.s32.totalorder %v88_v27, 2 }
 0x10b   :  { %v167_v56 = vsel %vm95_vm3, %v279_v54, 0.0  ;;  %vm210_vm12 = vcmp.eq.s32.totalorder %v88_v27, 1  ;;  %vm209_vm13 = vcmp.eq.s32.totalorder %v88_v27, 0 }
 0x10c   :  { %280 = vpow2.f32 %v144_v48  ;;  %v153_v51 = vsel %vm96_vm6, %v151_v49, 0.0  ;;  %v169_v59 = vsel %vm154_vm8, %v167_v56, 0.0 }
 0x10d   :  { %v156_v53 = vsel %vm154_vm8, %v153_v51, 0.0 }
 0x10e   :  { %v157_v55 = vadd.f32 %v156_v53, %v155_v52 }
 0x110   :  { %158 = vadd.xlane.f32.xlu2 %v157_v55 }
 0x112   :  { %v281_v57 = vpop.eup %280 }
 0x113   :  { %v168_v58 = vsel %vm96_vm6, %v281_v57, 0.0 }
 0x114   :  { %v170_v60 = vsel %vm154_vm8, %v168_v58, 0.0 }
 0x115   :  { %v171_v61 = vadd.f32 %v170_v60, %v169_v59 }
 0x117   :  { %172 = vadd.xlane.f32.xlu0 %v171_v61 }
 0x118   :  { %186 = vadd.xlane.f32.xlu2 %v185_v38 }
 0x11f   :  { %200 = vadd.xlane.f32.xlu0 %v199_v37 }
 0x183   :  { %v159_v62 = vpop.xlane.xlu2 %158 }
 0x184   :  { %v160_v63 = vrot.slane %v159_v62, 4 }
 0x186   :  { %v161_v0 = vadd.f32 %v160_v63, %v159_v62 }
 0x188   :  { %v162_v2 = vrot.slane %v161_v0, 2 }
 0x18a   :  { %v173_v3 = vpop.xlane.xlu0 %172  ;;  %v163_v4 = vadd.f32 %v162_v2, %v161_v0 }
 0x18b   :  { %v174_v1 = vrot.slane %v173_v3, 4  ;;  %v187_v5 = vpop.xlane.xlu2 %186 }
 0x18c   :  { %v188_v8 = vrot.slane %v187_v5, 4  ;;  %v164_v9 = vrot.slane %v163_v4, 1 }
 0x18d   :  { %v175_v6 = vadd.f32 %v174_v1, %v173_v3 }
 0x18e   :  { %v189_v10 = vadd.f32 %v188_v8, %v187_v5  ;;  %v165_v11 = vadd.f32 %v164_v9, %v163_v4 }
 0x18f   :  { %v176_v12 = vrot.slane %v175_v6, 2 }
 0x190   :  { %v190_v13 = vrot.slane %v189_v10, 2  ;;  %257 = vpush %v165_v11 }
 0x191   :  { %v177_v14 = vadd.f32 %v176_v12, %v175_v6 }
 0x192   :  { %v191_v15 = vadd.f32 %v190_v13, %v189_v10  ;;  %v201_v16 = vpop.xlane.xlu0 %200 }
 0x193   :  { %v202_v17 = vrot.slane %v201_v16, 4  ;;  %v178_v18 = vrot.slane %v177_v14, 1 }
 0x194   :  { %v192_v19 = vrot.slane %v191_v15, 1 }
 0x195   :  { %v203_v20 = vadd.f32 %v202_v17, %v201_v16  ;;  %v179_v21 = vadd.f32 %v178_v18, %v177_v14 }
 0x196   :  { %v193_v22 = vadd.f32 %v192_v19, %v191_v15 }
 0x197   :  { %v204_v23 = vrot.slane %v203_v20, 2  ;;  %259 = vpush %v179_v21 }
 0x198   :  { %261 = vpush %v193_v22 }
 0x199   :  { %v205_v24 = vadd.f32 %v204_v23, %v203_v20 }
 0x19b   :  { %v206_v25 = vrot.slane %v205_v24, 1 }
 0x19d   :  { %v207_v26 = vadd.f32 %v206_v25, %v205_v24 }
 0x19f   :  { %263 = vpush %v207_v26 }
 0x1c1   :  { %s258_s0 = spop %257 }
 0x1c2   :  { %v219_v7 = vstv %s258_s0 }
 0x1c8   :  { %s260_s1 = spop %259 }
 0x1c9   :  { %s262_s17 = spop %261  ;;  %v217_v31 = vstv %s260_s1 }
 0x1ca   :  { %v215_v29 = vstv %s262_s17 }
 0x1d0   :  { %s264_s18 = spop %263 }
 0x1d1   :  { %v213_v28 = vstv %s264_s18 }
 0x1d2   :  { %v214_v30 = vsel %vm212_vm10, %v213_v28, 0.0 }
 0x1d3   :  { %v216_v32 = vsel %vm211_vm11, %v215_v29, %v214_v30 }
 0x1d4   :  { %v218_v33 = vsel %vm210_vm12, %v217_v31, %v216_v32 }
 0x1d5   :  { %v220_v34 = vsel %vm209_vm13, %v219_v7, %v218_v33 }
 0x1d6   :  { %228 = vst [vmem:[#allocation3] sm:$0xff] %v220_v34 }
 0x1d7   :  { %239 = dma.vmem_to_hbm [thread:$0]  %s235_s20, 128, %s237_s23, [#allocation4]  }
 0x1d8   :  { %306 = dma.done.wait [#allocation4], 128  }
 0x1d9   :  { %307 = vsyncadd [#allocation4], 4294967168 }
 0x1da   :  { %244 = vsyncpa [#allocation4], 1 }

</bundles_post_ra>
